<compile_context>
chip_gen: v6e
topology: v6e:2x2x1
jax: 0.10.0
libtpu: 0.0.40
codegen_flags: <defaults>
</compile_context>

<pallas_src>
import jax
import jax.numpy as jnp
from jax.experimental import pallas as pl
from jax.experimental.pallas import tpu as pltpu


def _round_up(x: int, m: int) -> int:
    return (x + m - 1) // m * m


def _temp_scale_kernel(inv_t_ref, p_ref, out_ref):
    """One (tile_b, C) tile of temperature-scaled softmax.

    inv_t_ref : SMEM (1,) f32    precomputed 1 / (exp(log_temp) + eps)
    p_ref     : VMEM (tile_b, C) f32 probabilities
    out_ref   : VMEM (tile_b, C) f32 calibrated probabilities
    """
    eps = jnp.float32(1e-12)
    inv_t = inv_t_ref[0]                         # loop-invariant scalar

    # z / temp, numerically stable softmax over the class (lane) axis.
    z = jnp.log(p_ref[...] + eps) * inv_t
    m = jnp.max(z, axis=-1, keepdims=True)
    e = jnp.exp(z - m)
    denom = jnp.sum(e, axis=-1, keepdims=True)   # >= 1 (max lane has e == 1)

    # EUP approximate reciprocal + one Newton step on the (tile_b, 1) column:
    # negligible VALU work, restores full f32 accuracy.
    r = pl.reciprocal(denom, approx=True)
    r = r * (2.0 - denom * r)

    out_ref[...] = e * r


def _chip_info():
    """(num_tensorcores, usable VMEM budget in bytes) for the local chip."""
    try:
        kind = jax.devices()[0].device_kind.lower()
    except Exception:  # pragma: no cover - defensive fallback
        kind = ""
    is_v7 = "7" in kind
    num_tc = 2 if is_v7 else 1                    # v7x: 2 TCs/chip; v5e/v6e: 1
    vmem_budget = (48 << 20) if is_v7 else (64 << 20)
    return num_tc, vmem_budget


def _choose_tile_b(B: int, C: int, num_tc: int, vmem_budget: int,
                   max_tile: int = 1024) -> int:
    """Balanced batch tile: largest multiple-of-8 tile whose true VMEM
    footprint (double-buffered in/out + live temporaries) fits the budget,
    split across `num_tc` TensorCores when the batch is large enough."""
    c_lanes = _round_up(max(C, 1), 128)           # VMEM layout width per row
    # 2 in + 2 out double-buffered tiles + ~3-4 live f32 temporaries (z, e, ...).
    per_row_bytes = 32 * c_lanes
    cap = (vmem_budget // per_row_bytes) // 8 * 8
    cap = max(8, min(cap, max_tile))

    b8 = _round_up(B, 8)
    n_blocks = -(-b8 // cap)
    if num_tc > 1 and b8 >= 8 * num_tc:
        # v7x megacore: keep the block count a multiple of the TC count so the
        # two cores get balanced halves.
        n_blocks = _round_up(max(n_blocks, num_tc), num_tc)
    tile_b = _round_up(-(-b8 // n_blocks), 8)
    return tile_b


def temperature_scaling_calibrate(p: jax.Array, log_temp: jax.Array) -> jax.Array:
    """p: (B, C) probabilities (rows ~sum to 1); log_temp: (1,) f32.

    Returns calibrated probabilities, shape (B, C) f32.
    """
    B, C = p.shape
    eps = jnp.float32(1e-12)

    num_tc, vmem_budget = _chip_info()
    tile_b = _choose_tile_b(B, C, num_tc, vmem_budget)
    grid = ((B + tile_b - 1) // tile_b,)          # partial last block is OK

    pp = p.astype(jnp.float32)
    # Hoist the loop-invariant temperature out of the kernel (one scalar op).
    inv_t = (1.0 / (jnp.exp(log_temp.astype(jnp.float32)) + eps)).reshape((1,))

    out = pl.pallas_call(
        _temp_scale_kernel,
        out_shape=jax.ShapeDtypeStruct((B, C), jnp.float32),
        grid=grid,
        in_specs=[
            pl.BlockSpec(memory_space=pltpu.SMEM),            # inv_t scalar
            pl.BlockSpec((tile_b, C), lambda i: (i, 0)),      # p tile (full C)
        ],
        out_specs=pl.BlockSpec((tile_b, C), lambda i: (i, 0)),
        compiler_params=pltpu.CompilerParams(
            dimension_semantics=("parallel",),
            vmem_limit_bytes=vmem_budget,
        ),
        cost_estimate=pl.CostEstimate(
            flops=5 * B * C,
            transcendentals=2 * B * C,
            bytes_accessed=8 * B * C,
        ),
    )(inv_t, pp)
    return out


def _reference(p, log_temp):
    eps = 1e-12
    z = jnp.log(p + eps)
    temp = jnp.exp(log_temp)
    z_scaled = z / (temp + eps)
    return jax.nn.softmax(z_scaled, axis=-1)


if __name__ == "__main__":
    key = jax.random.PRNGKey(0)

    # Parameter init matching nn.Parameter(log(tensor([init_temp]))), init_temp=1.5.
    init_temp = 1.5
    log_temp = jnp.log(jnp.array([init_temp], dtype=jnp.float32))

    # Primary small shape matching the module's (batch, C) contract.
    B, C = 8, 16
    logits = jax.random.normal(key, (B, C), dtype=jnp.float32)
    p = jax.nn.softmax(logits, axis=-1)

    p_cal = jax.block_until_ready(temperature_scaling_calibrate(p, log_temp))
    ref = _reference(p, log_temp)
    assert p_cal.shape == (B, C)
    assert jnp.allclose(p_cal, ref, atol=1e-5, rtol=1e-5)
    assert jnp.allclose(jnp.sum(p_cal, axis=-1), 1.0, atol=1e-5)

    # Second shape exercising unaligned B and C (partial last block, C % 128 != 0).
    B2, C2 = 12, 10
    logits2 = jax.random.normal(jax.random.PRNGKey(1), (B2, C2), dtype=jnp.float32)
    p2 = jax.nn.softmax(logits2, axis=-1)
    p2_cal = jax.block_until_ready(temperature_scaling_calibrate(p2, log_temp))
    ref2 = _reference(p2, log_temp)
    assert p2_cal.shape == (B2, C2)
    assert jnp.allclose(p2_cal, ref2, atol=1e-5, rtol=1e-5)
    assert jnp.allclose(jnp.sum(p2_cal, axis=-1), 1.0, atol=1e-5)

    print("KERNEL_OK")
</pallas_src>

<mosaic_0001>
module attributes {stable_mosaic.version = 11 : i64} {
  func.func @_temp_scale_kernel(%arg0: i32, %arg1: memref<1xf32, #tpu.memory_space<smem>>, %arg2: memref<8x16xf32, #tpu.memory_space<vmem>>, %arg3: memref<8x16xf32, #tpu.memory_space<vmem>>) attributes {dimension_semantics = [#tpu.dimension_semantics<parallel>], iteration_bounds = array<i64: 1>, scalar_prefetch = 0 : i64, scratch_operands = 0 : i64, tpu.core_type = #tpu.core_type<tc>, window_params = [{transform_indices = @transform_0, window_bounds = array<i64: 1>}, {transform_indices = @transform_1, window_bounds = array<i64: 8, 16>}, {transform_indices = @transform_2, window_bounds = array<i64: 8, 16>}]} {
    %c0 = arith.constant 0 : index
    %0 = memref.load %arg1[%c0] : memref<1xf32, #tpu.memory_space<smem>>
    %c0_0 = arith.constant 0 : index
    %c0_1 = arith.constant 0 : index
    %1 = vector.load %arg2[%c0_0, %c0_1] : memref<8x16xf32, #tpu.memory_space<vmem>>, vector<8x16xf32>
    %cst = arith.constant 9.99999996E-13 : f32
    %2 = vector.broadcast %cst : f32 to vector<8x16xf32>
    %3 = arith.addf %1, %2 : vector<8x16xf32>
    %4 = math.log %3 : vector<8x16xf32>
    %5 = vector.broadcast %0 : f32 to vector<8x16xf32>
    %6 = arith.mulf %4, %5 : vector<8x16xf32>
    %cst_2 = arith.constant dense<0xFF800000> : vector<8xf32>
    %7 = vector.multi_reduction <maximumf>, %6, %cst_2 [1] : vector<8x16xf32> to vector<8xf32>
    %8 = vector.shape_cast %7 : vector<8xf32> to vector<8x1xf32>
    %9 = vector.broadcast %8 : vector<8x1xf32> to vector<8x16xf32>
    %10 = arith.subf %6, %9 : vector<8x16xf32>
    %11 = math.exp %10 : vector<8x16xf32>
    %cst_3 = arith.constant dense<0.000000e+00> : vector<8xf32>
    %12 = vector.multi_reduction <add>, %11, %cst_3 [1] : vector<8x16xf32> to vector<8xf32>
    %13 = vector.shape_cast %12 : vector<8xf32> to vector<8x1xf32>
    %14 = tpu.reciprocal %13 {approx = true} : vector<8x1xf32> -> vector<8x1xf32>
    %15 = arith.mulf %13, %14 : vector<8x1xf32>
    %cst_4 = arith.constant 2.000000e+00 : f32
    %16 = vector.broadcast %cst_4 : f32 to vector<8x1xf32>
    %17 = arith.subf %16, %15 : vector<8x1xf32>
    %18 = arith.mulf %14, %17 : vector<8x1xf32>
    %19 = vector.broadcast %18 : vector<8x1xf32> to vector<8x16xf32>
    %20 = arith.mulf %11, %19 : vector<8x16xf32>
    %c0_5 = arith.constant 0 : index
    %c0_6 = arith.constant 0 : index
    %21 = vector.load %arg3[%c0_5, %c0_6] : memref<8x16xf32, #tpu.memory_space<vmem>>, vector<8x16xf32>
    tpu.vector_store %arg3[%c0_5, %c0_6], %20 {strides = array<i32>} : memref<8x16xf32, #tpu.memory_space<vmem>>, vector<8x16xf32>,
    return
  }
  func.func @transform_0(%arg0: i32) -> i32 {
    %c0_i32 = arith.constant 0 : i32
    %c0_i32_0 = arith.constant 0 : i32
    return %c0_i32 : i32
  }
  func.func @transform_1(%arg0: i32) -> (i32, i32) {
    %c0_i32 = arith.constant 0 : i32
    %c0_i32_0 = arith.constant 0 : i32
    return %arg0, %c0_i32 : i32, i32
  }
  func.func @transform_2(%arg0: i32) -> (i32, i32) {
    %c0_i32 = arith.constant 0 : i32
    %c0_i32_0 = arith.constant 0 : i32
    return %arg0, %c0_i32 : i32, i32
  }
}

</mosaic_0001>

<bundles_post_ra>
// kernel: tpu_custom_call.1
= control target key start
LH: loop header
LB: loop body
LE: loop exit
PB: predicated region body
PF: predicated region fallthrough
CT: control target
= control target key end

     0   :  { %8 = vsyncpa [#allocation4], 0  ;;  %s144_s0 = inlined_call_operand.<no memory space> [shape: f32[1], index: 0, kind: input, shape index: {}]   ;;  %s145_s1 = inlined_call_operand.hbm [shape: f32[8,16], index: 1, kind: input, shape index: {}]   ;;  %s146_s2 = inlined_call_operand.hbm [shape: f32[8,16], index: 2, kind: output, shape index: {}]  }
   0x1   :  { %9 = vsyncpa [#allocation5], 0  ;;  %s115_s9 = smov [#allocation3]  }
   0x2   :  { %s18_s10 = sshll.u32 %s115_s9, 4  ;;  %s19_s10 = int_to_ptr.vmem [resolvable:$true] %s18_s10 }
   0x3   :  { %s79_s11 = scalar_lea.vmem %s19_s10, 128  ;;  %p84_p1 = scmp.lt.s32.totalorder %s19_s10, %s19_s10 }
   0x4   :  { %p80_p0 = scmp.ne.s32.totalorder %s19_s10, %s79_s11  ;;  %p85_p2 = scmp.lt.s32.totalorder %s79_s11, %s79_s11 }
   0x6   :  { %p86_p3 = por %p85_p2, %p84_p1 }
   0x8   :  { %p87_p4 = pnand %p86_p3, %p80_p0 }
   0xa   :  { %90 = shalt.err (!%p87_p4)
}
   0xb   :  { %21 = dma.hbm_to_vmem [thread:$0]  %s145_s1, 128, %s19_s10, [#allocation4]  }
   0xc   :  { %111 = dma.done.wait [#allocation4], 128  }
   0xd   :  { %112 = vsyncadd [#allocation4], 4294967168  ;;  %v26_v0 = vld [vmem:[#allocation3] sm:$0xff]  ;;  %v30_v3 = vstv %s144_s0  ;;  %vm32_vm0 = vcmask 130048   ;;  %s116_s0 = smov [#allocation6]  }
   0xe   :  { %v27_v1 = vadd.f32 1e-12, %v26_v0  ;;  %s54_s1 = sshll.u32 %s116_s0, 4  ;;  %s55_s1 = int_to_ptr.vmem [resolvable:$true] %s54_s1 }
   0xf   :  { %s91_s16 = scalar_lea.vmem %s55_s1, 128  ;;  %p96_p6 = scmp.lt.s32.totalorder %s55_s1, %s55_s1 }
  0x10   :  { %65 = vlog2.f32 %v27_v1  ;;  %p92_p5 = scmp.ne.s32.totalorder %s55_s1, %s91_s16  ;;  %p97_p7 = scmp.lt.s32.totalorder %s91_s16, %s91_s16 }
  0x12   :  { %p98_p8 = por %p97_p7, %p96_p6 }
  0x14   :  { %p99_p9 = pnand %p98_p8, %p92_p5 }
  0x1d   :  { %v66_v2 = vpop.eup %65 }
  0x1e   :  { %v29_v4 = vmul.f32 0.6931472, %v66_v2 }
  0x20   :  { %v31_v5 = vmul.f32 %v30_v3, %v29_v4 }
  0x22   :  { %v33_v6 = vsel %vm32_vm0, %v31_v5, -inf }
  0x23   :  { %34 = vmax.xlane.f32.xlu0 %v33_v6 }
  0xac   :  { %v35_v7 = vpop.xlane.xlu0 %34 }
  0xad   :  { %v36_v8 = vsub.f32 %v31_v5, %v35_v7 }
  0xaf   :  { %v37_v9 = vmul.f32 1.442695, %v36_v8 }
  0xb1   :  { %67 = vpow2.f32 %v37_v9 }
  0xbe   :  { %v68_v10 = vpop.eup %67 }
  0xbf   :  { %v39_v11 = vsel %vm32_vm0, %v68_v10, 0.0 }
  0xc0   :  { %40 = vadd.xlane.f32.xlu0 %v39_v11 }
 0x149   :  { %v41_v12 = vpop.xlane.xlu0 %40 }
 0x14a   :  { %69 = vrcp.f32 %v41_v12 }
 0x157   :  { %v70_v13 = vpop.eup %69 }
 0x158   :  { %v43_v14 = vmul.f32 %v70_v13, %v41_v12 }
 0x15a   :  { %v44_v15 = vsub.f32 2.0, %v43_v14 }
 0x15c   :  { %v45_v16 = vmul.f32 %v70_v13, %v44_v15 }
 0x15e   :  { %v46_v17 = vmul.f32 %v68_v10, %v45_v16 }
 0x160   :  { %47 = vst.msk [vmem:[#allocation6] sm:$0xff] %vm32_vm0, %v46_v17 }
 0x161   :  { %102 = shalt.err (!%p99_p9)
}
 0x162   :  { %57 = dma.vmem_to_hbm [thread:$0]  %s55_s1, 128, %s146_s2, [#allocation5]  }
 0x163   :  { %113 = dma.done.wait [#allocation5], 128  }
 0x164   :  { %114 = vsyncadd [#allocation5], 4294967168 }
 0x165   :  { %61 = vsyncpa [#allocation4], 1 }
 0x166   :  { %62 = vsyncpa [#allocation5], 1 }

</bundles_post_ra>
